<compile_context>
chip_gen: v7x
topology: tpu7x:2x2x1
jax: 0.10.0
libtpu: 0.0.40
codegen_flags: <defaults>
</compile_context>

<pallas_src>
import functools

import jax
import jax.numpy as jnp
from jax.experimental import pallas as pl
from jax.experimental.pallas import tpu as pltpu

NUM_CLASSES = 5
SMOOTHING = 0.05
CONFIDENCE = 1.0 - SMOOTHING
OFF_VAL = SMOOTHING / (NUM_CLASSES - 1)
TAYLOR_N = 2  # n=2 -> fn = 1 + x + x^2/2


def taylor_ce_kernel(x_ref, labels_ref, out_ref, *, n_valid, block_n):
    # x_ref:      (C, BN) logits block — classes on sublanes, rows on lanes
    # labels_ref: (1, BN) int32 targets
    # out_ref:    (1, 128) f32 — this block's partial sum, broadcast across lanes
    pid = pl.program_id(0)

    x = x_ref[...].astype(jnp.float32)                         # (C, BN)
    labels = labels_ref[...]                                   # (1, BN)

    # TaylorSoftmax(n=2): fn = 1 + x + x^2/2  (>= 0.5 > 0, so log is safe)
    fn = 1.0 + x + 0.5 * (x * x)                               # (C, BN)  VPU
    log_fn = jnp.log(fn)                                       # (C, BN)  EUP

    # Class reductions: 5-row sublane reduces (lane-dense).
    denom = jnp.sum(fn, axis=0, keepdims=True)                 # (1, BN)
    sum_log_fn = jnp.sum(log_fn, axis=0, keepdims=True)        # (1, BN)

    # log fn[target] via a 5-way masked accumulate over sublane rows (reuses log_fn,
    # no extra transcendental).
    cls = jax.lax.broadcasted_iota(jnp.int32, fn.shape, 0)     # (C, BN)
    log_fn_tgt = jnp.sum(jnp.where(cls == labels, log_fn, 0.0),
                         axis=0, keepdims=True)                # (1, BN)

    # Folded label-smoothing loss (see header):
    per_row = (jnp.log(denom)
               - OFF_VAL * sum_log_fn
               - (CONFIDENCE - OFF_VAL) * log_fn_tgt)          # (1, BN)

    # Mask tail-block padding rows so they don't leak into the mean.
    row_id = pid * block_n + jax.lax.broadcasted_iota(jnp.int32, per_row.shape, 1)
    per_row = jnp.where(row_id < n_valid, per_row, 0.0)

    # Lane-dense scalar writeback: broadcast this block's partial sum over 128 lanes.
    out_ref[...] = jnp.full((1, 128), jnp.sum(per_row), dtype=jnp.float32)


def taylor_cross_entropy_loss(logits, labels, block_n=16384):
    """logits: (N, C) float (f32 or bf16), labels: (N,) int. Returns scalar f32 loss."""
    n, c = logits.shape
    assert c == NUM_CLASSES

    # Lane-dense layout: rows on the 128-lane axis, the 5 classes on sublanes.
    xt = logits.T                                              # (C, N)
    labels2d = labels.astype(jnp.int32).reshape(1, n)          # (1, N)

    # Block size: multiple of 128, no larger than the (128-rounded) problem.
    bn = min(block_n, ((n + 127) // 128) * 128)
    bn = ((bn + 127) // 128) * 128
    n_blocks = pl.cdiv(n, bn)
    n_pad = n_blocks * bn
    if n_pad != n:
        # fn(0) = 1 -> log(1) = 0, finite; padded rows are masked in-kernel anyway.
        xt = jnp.pad(xt, ((0, 0), (0, n_pad - n)))
        labels2d = jnp.pad(labels2d, ((0, 0), (0, n_pad - n)))

    kernel = functools.partial(taylor_ce_kernel, n_valid=n, block_n=bn)
    partials = pl.pallas_call(
        kernel,
        out_shape=jax.ShapeDtypeStruct((1, n_blocks * 128), jnp.float32),
        grid_spec=pltpu.PrefetchScalarGridSpec(
            num_scalar_prefetch=0,
            grid=(n_blocks,),
            in_specs=[
                pl.BlockSpec((NUM_CLASSES, bn), lambda i: (0, i)),  # logits (C, BN)
                pl.BlockSpec((1, bn), lambda i: (0, i)),            # labels (1, BN)
            ],
            out_specs=pl.BlockSpec((1, 128), lambda i: (0, i)),
        ),
        compiler_params=pltpu.CompilerParams(
            dimension_semantics=("parallel",),                  # megacore-shardable on v7x
            vmem_limit_bytes=32 << 20,                          # headroom, safe on v5e/v6e/v7x
        ),
    )(xt, labels2d)

    # Each block wrote its scalar partial broadcast across a 128-lane slab; take lane 0.
    block_sums = partials.reshape(n_blocks, 128)[:, 0]
    return jnp.sum(block_sums) / jnp.float32(n)


def _reference(logits, labels):
    # Pure-JAX reference mirroring the PyTorch module exactly (incl. the log_softmax pass).
    x = logits.astype(jnp.float32)
    fn = 1.0 + x + 0.5 * x * x
    p = fn / jnp.sum(fn, axis=1, keepdims=True)
    lp = jnp.log(p)
    pred = jax.nn.log_softmax(lp, axis=-1)
    true_dist = jnp.full_like(pred, OFF_VAL)
    true_dist = true_dist.at[jnp.arange(x.shape[0]), labels].set(CONFIDENCE)
    return jnp.mean(jnp.sum(-true_dist * pred, axis=-1))


if __name__ == "__main__":
    key = jax.random.PRNGKey(0)
    k1, k2, k3, k4 = jax.random.split(key, 4)

    # Small case: N not a multiple of 128 -> exercises the tail mask, single block.
    N1 = 16
    logits1 = jax.random.normal(k1, (N1, NUM_CLASSES), dtype=jnp.float32)
    labels1 = jax.random.randint(k2, (N1,), 0, NUM_CLASSES, dtype=jnp.int32)
    loss1 = taylor_cross_entropy_loss(logits1, labels1)
    jax.block_until_ready(loss1)
    ref1 = _reference(logits1, labels1)
    assert jnp.allclose(loss1, ref1, rtol=1e-5, atol=1e-5), (loss1, ref1)

    # Multi-block case: tiny block_n forces 3 grid steps + tail masking of the last block.
    N2 = 300
    logits2 = jax.random.normal(k3, (N2, NUM_CLASSES), dtype=jnp.float32)
    labels2 = jax.random.randint(k4, (N2,), 0, NUM_CLASSES, dtype=jnp.int32)
    loss2 = taylor_cross_entropy_loss(logits2, labels2, block_n=128)
    jax.block_until_ready(loss2)
    ref2 = _reference(logits2, labels2)
    assert jnp.allclose(loss2, ref2, rtol=1e-5, atol=1e-5), (loss2, ref2)

    print("KERNEL_OK")
</pallas_src>

<mosaic_0001>
module attributes {stable_mosaic.version = 11 : i64} {
  func.func @taylor_ce_kernel(%arg0: i32, %arg1: memref<5x128xf32, #tpu.memory_space<vmem>>, %arg2: memref<1x128xi32, #tpu.memory_space<vmem>>, %arg3: memref<1x128xf32, #tpu.memory_space<vmem>>) attributes {dimension_semantics = [#tpu.dimension_semantics<parallel>], iteration_bounds = array<i64: 1>, scalar_prefetch = 0 : i64, scratch_operands = 0 : i64, tpu.core_type = #tpu.core_type<tc>, window_params = [{transform_indices = @transform_0, window_bounds = array<i64: 5, 128>}, {transform_indices = @transform_1, window_bounds = array<i64: 1, 128>}, {transform_indices = @transform_2, window_bounds = array<i64: 1, 128>}]} {
    %c0 = arith.constant 0 : index
    %c0_0 = arith.constant 0 : index
    %0 = vector.load %arg1[%c0, %c0_0] : memref<5x128xf32, #tpu.memory_space<vmem>>, vector<5x128xf32>
    %c0_1 = arith.constant 0 : index
    %c0_2 = arith.constant 0 : index
    %1 = vector.load %arg2[%c0_1, %c0_2] : memref<1x128xi32, #tpu.memory_space<vmem>>, vector<1x128xi32>
    %cst = arith.constant 1.000000e+00 : f32
    %2 = vector.broadcast %cst : f32 to vector<5x128xf32>
    %3 = arith.addf %2, %0 : vector<5x128xf32>
    %4 = arith.mulf %0, %0 : vector<5x128xf32>
    %cst_3 = arith.constant 5.000000e-01 : f32
    %5 = vector.broadcast %cst_3 : f32 to vector<5x128xf32>
    %6 = arith.mulf %5, %4 : vector<5x128xf32>
    %7 = arith.addf %3, %6 : vector<5x128xf32>
    %8 = math.log %7 : vector<5x128xf32>
    %cst_4 = arith.constant dense<0.000000e+00> : vector<128xf32>
    %9 = vector.multi_reduction <add>, %7, %cst_4 [0] : vector<5x128xf32> to vector<128xf32>
    %10 = vector.shape_cast %9 : vector<128xf32> to vector<1x128xf32>
    %cst_5 = arith.constant dense<0.000000e+00> : vector<128xf32>
    %11 = vector.multi_reduction <add>, %8, %cst_5 [0] : vector<5x128xf32> to vector<128xf32>
    %12 = vector.shape_cast %11 : vector<128xf32> to vector<1x128xf32>
    %13 = tpu.iota {dimensions = array<i32: 0>} : vector<5x128xi32>
    %14 = vector.broadcast %1 : vector<1x128xi32> to vector<5x128xi32>
    %15 = arith.cmpi eq, %13, %14 : vector<5x128xi32>
    %cst_6 = arith.constant 0.000000e+00 : f32
    %16 = vector.broadcast %cst_6 : f32 to vector<5x128xf32>
    %17 = arith.select %15, %8, %16 : vector<5x128xi1>, vector<5x128xf32>
    %cst_7 = arith.constant dense<0.000000e+00> : vector<128xf32>
    %18 = vector.multi_reduction <add>, %17, %cst_7 [0] : vector<5x128xf32> to vector<128xf32>
    %19 = vector.shape_cast %18 : vector<128xf32> to vector<1x128xf32>
    %20 = math.log %10 : vector<1x128xf32>
    %cst_8 = arith.constant 1.250000e-02 : f32
    %21 = vector.broadcast %cst_8 : f32 to vector<1x128xf32>
    %22 = arith.mulf %21, %12 : vector<1x128xf32>
    %23 = arith.subf %20, %22 : vector<1x128xf32>
    %cst_9 = arith.constant 9.375000e-01 : f32
    %24 = vector.broadcast %cst_9 : f32 to vector<1x128xf32>
    %25 = arith.mulf %24, %19 : vector<1x128xf32>
    %26 = arith.subf %23, %25 : vector<1x128xf32>
    %c128_i32 = arith.constant 128 : i32
    %27 = arith.muli %arg0, %c128_i32 : i32
    %28 = tpu.iota {dimensions = array<i32: 1>} : vector<1x128xi32>
    %29 = vector.broadcast %27 : i32 to vector<1x128xi32>
    %30 = arith.addi %29, %28 : vector<1x128xi32>
    %c16_i32 = arith.constant 16 : i32
    %31 = vector.broadcast %c16_i32 : i32 to vector<1x128xi32>
    %32 = arith.cmpi slt, %30, %31 : vector<1x128xi32>
    %cst_10 = arith.constant 0.000000e+00 : f32
    %33 = vector.broadcast %cst_10 : f32 to vector<1x128xf32>
    %34 = arith.select %32, %26, %33 : vector<1x128xi1>, vector<1x128xf32>
    %35 = vector.shape_cast %34 : vector<1x128xf32> to vector<1x1x128xf32>
    %cst_11 = arith.constant dense<0.000000e+00> : vector<1xf32>
    %36 = vector.multi_reduction <add>, %35, %cst_11 [1, 2] : vector<1x1x128xf32> to vector<1xf32>
    %37 = vector.shape_cast %36 : vector<1xf32> to vector<1x1x1xf32>
    %38 = vector.extract %37[0, 0, 0] : f32 from vector<1x1x1xf32>
    %39 = vector.broadcast %38 : f32 to vector<1x128xf32>
    %c0_12 = arith.constant 0 : index
    %c0_13 = arith.constant 0 : index
    %40 = vector.load %arg3[%c0_12, %c0_13] : memref<1x128xf32, #tpu.memory_space<vmem>>, vector<1x128xf32>
    tpu.vector_store %arg3[%c0_12, %c0_13], %39 {strides = array<i32>} : memref<1x128xf32, #tpu.memory_space<vmem>>, vector<1x128xf32>,
    return
  }
  func.func @transform_0(%arg0: i32) -> (i32, i32) {
    %c0_i32 = arith.constant 0 : i32
    %c0_i32_0 = arith.constant 0 : i32
    return %c0_i32, %arg0 : i32, i32
  }
  func.func @transform_1(%arg0: i32) -> (i32, i32) {
    %c0_i32 = arith.constant 0 : i32
    %c0_i32_0 = arith.constant 0 : i32
    return %c0_i32, %arg0 : i32, i32
  }
  func.func @transform_2(%arg0: i32) -> (i32, i32) {
    %c0_i32 = arith.constant 0 : i32
    %c0_i32_0 = arith.constant 0 : i32
    return %c0_i32, %arg0 : i32, i32
  }
}

</mosaic_0001>

<bundles_post_ra>
// kernel: tpu_custom_call.1
= control target key start
LH: loop header
LB: loop body
LE: loop exit
PB: predicated region body
PF: predicated region fallthrough
CT: control target
= control target key end

     0   :  { %7 = vsyncpa [#allocation3], 0  ;;  %s207_s0 = inlined_call_operand.hbm [shape: f32[5,128], index: 0, kind: input, shape index: {}]   ;;  %s208_s1 = inlined_call_operand.vmem [shape: s32[1,128], index: 1, kind: input, shape index: {}]   ;;  %s209_s2 = inlined_call_operand.hbm [shape: f32[1,128], index: 2, kind: output, shape index: {}]  }
   0x1   :  { %8 = vsyncpa [#allocation4], 0  ;;  %s160_s9 = smov [#allocation2]   ;;  %s112_s13 = scalar_lea.hbm %s207_s0, 128 }
   0x2   :  { %s15_s10 = sshll.u32 %s160_s9, 4  ;;  %p113_p0 = scmp.ne.s32.totalorder %s207_s0, %s112_s13  ;;  %s16_s10 = int_to_ptr.vmem [resolvable:$true] %s15_s10 }
   0x3   :  { %p116_p1 = scmp.lt.u32.totalorder %s112_s13, %s207_s0 }
   0x5   :  { %p118_p2 = pnand %p116_p1, %p113_p0 }
   0x7   :  { %121 = shalt.err (!%p118_p2)
}
   0x8   :  { %s122_s18 = scalar_lea.vmem %s16_s10, 128  ;;  %p127_p4 = scmp.lt.s32.totalorder %s16_s10, %s16_s10 }
   0x9   :  { %p123_p3 = scmp.ne.s32.totalorder %s16_s10, %s122_s18  ;;  %p128_p5 = scmp.lt.s32.totalorder %s122_s18, %s122_s18 }
   0xb   :  { %p129_p6 = por %p128_p5, %p127_p4 }
   0xd   :  { %p130_p7 = pnand %p129_p6, %p123_p3 }
   0xf   :  { %133 = shalt.err (!%p130_p7)
}
  0x10   :  { %18 = dma.hbm_to_vmem [thread:$0]  %s207_s0, 128, %s16_s10, [#allocation3]  }
  0x11   :  { %156 = dma.done.wait [#allocation3], 128  }
  0x12   :  { %157 = vsyncadd [#allocation3], 4294967168  ;;  %v24_v0 = vld [vmem:[#allocation2] sm:$0x1f]  ;;  %vm32_vm0 = vcmask 1044480   ;;  %v47_v7 = vlaneseq  ;;  %vm75_vm3 = vcmask 1040384  }
  0x13   :  { %v26_v1 = vadd.f32 1.0, %v24_v0  ;;  %v27_v2 = vmul.f32 %v24_v0, %v24_v0  ;;  %v103_v11 = vld [vmem:[%s208_s1] ss:$0 sm:$0xff]  ;;  %s161_s0 = smov [#allocation5]  }
  0x14   :  { %v48_v10 = vshrl.u32 %v47_v7, 7  ;;  %v70_v34 = vand.u32 127, %v47_v7  ;;  %s94_s1 = sshll.u32 %s161_s0, 4  ;;  %s95_s1 = int_to_ptr.vmem [resolvable:$true] %s94_s1 }
  0x15   :  { %v28_v3 = vmul.f32 0.5, %v27_v2  ;;  %s134_s24 = scalar_lea.vmem %s95_s1, 16  ;;  %s138_s25 = scalar_lea.vmem %s95_s1, 32 }
  0x16   :  { %vm53_vm1 = vcmp.eq.s32.totalorder %v48_v10, %v103_v11  ;;  %vm73_vm2 = vcmp.lt.s32.totalorder %v70_v34, 16  ;;  %p135_p8 = scmp.ne.s32.totalorder %s95_s1, %s134_s24  ;;  %p139_p9 = scmp.lt.s32.totalorder %s95_s1, %s95_s1 }
  0x17   :  { %v29_v4 = vadd.f32 %v28_v3, %v26_v1  ;;  %p140_p10 = scmp.lt.s32.totalorder %s138_s25, %s134_s24 }
  0x19   :  { %108 = vlog2.f32 %v29_v4  ;;  %v33_v5 = vsel %vm32_vm0, %v29_v4, 0.0  ;;  %p141_p11 = por %p140_p10, %p139_p9 }
  0x1a   :  { %v34_v6 = vrot.slane %v33_v5, 4 }
  0x1b   :  { %p142_p12 = pnand %p141_p11, %p135_p8 }
  0x1c   :  { %v35_v8 = vadd.f32 %v34_v6, %v33_v5 }
  0x1e   :  { %v36_v9 = vrot.slane %v35_v8, 2 }
  0x20   :  { %v37_v12 = vadd.f32 %v36_v9, %v35_v8 }
  0x22   :  { %v38_v13 = vrot.slane %v37_v12, 1 }
  0x23   :  { %v109_v14 = vpop.eup %108 }
  0x24   :  { %v31_v15 = vmul.f32 0.6931472, %v109_v14  ;;  %v39_v16 = vadd.f32 %v38_v13, %v37_v12 }
  0x26   :  { %v40_v17 = vsel %vm32_vm0, %v31_v15, 0.0  ;;  %v54_v18 = vsel %vm53_vm1, %v31_v15, 0.0  ;;  %110 = vlog2.f32 %v39_v16 }
  0x27   :  { %v41_v19 = vrot.slane %v40_v17, 4  ;;  %v55_v20 = vsel %vm32_vm0, %v54_v18, 0.0 }
  0x28   :  { %v56_v21 = vrot.slane %v55_v20, 4 }
  0x29   :  { %v42_v22 = vadd.f32 %v41_v19, %v40_v17 }
  0x2a   :  { %v57_v23 = vadd.f32 %v56_v21, %v55_v20 }
  0x2b   :  { %v43_v24 = vrot.slane %v42_v22, 2 }
  0x2c   :  { %v58_v25 = vrot.slane %v57_v23, 2 }
  0x2d   :  { %v44_v26 = vadd.f32 %v43_v24, %v42_v22 }
  0x2e   :  { %v59_v27 = vadd.f32 %v58_v25, %v57_v23 }
  0x2f   :  { %v45_v28 = vrot.slane %v44_v26, 1 }
  0x30   :  { %v111_v29 = vpop.eup %110  ;;  %v60_v30 = vrot.slane %v59_v27, 1 }
  0x31   :  { %v46_v31 = vadd.f32 %v45_v28, %v44_v26  ;;  %v63_v32 = vmul.f32 0.6931472, %v111_v29 }
  0x32   :  { %v61_v33 = vadd.f32 %v60_v30, %v59_v27 }
  0x33   :  { %v64_v35 = vmul.f32 0.0125, %v46_v31 }
  0x34   :  { %v66_v36 = vmul.f32 0.9375, %v61_v33 }
  0x35   :  { %v65_v37 = vsub.f32 %v63_v32, %v64_v35 }
  0x37   :  { %v67_v38 = vsub.f32 %v65_v37, %v66_v36 }
  0x39   :  { %v74_v39 = vsel %vm73_vm2, %v67_v38, 0.0 }
  0x3a   :  { %v76_v40 = vsel %vm75_vm3, %v74_v39, 0.0 }
  0x3b   :  { %77 = vadd.xlane.f32.xlu0 %v76_v40 }
  0xc8   :  { %v78_v41 = vpop.xlane.xlu0 %77 }
  0xc9   :  { %v79_v42 = vrot.slane %v78_v41, 4 }
  0xcb   :  { %v80_v43 = vadd.f32 %v79_v42, %v78_v41 }
  0xcd   :  { %v81_v44 = vrot.slane %v80_v43, 2 }
  0xcf   :  { %v82_v45 = vadd.f32 %v81_v44, %v80_v43 }
  0xd1   :  { %v83_v46 = vrot.slane %v82_v45, 1 }
  0xd3   :  { %v84_v47 = vadd.f32 %v83_v46, %v82_v45 }
  0xd5   :  { %104 = vpush %v84_v47 }
 0x106   :  { %s105_s23 = spop %104 }
 0x107   :  { %v86_v48 = vstv %s105_s23 }
 0x108   :  { %87 = vst [vmem:[#allocation5] sm:$0x1] %v86_v48 }
 0x109   :  { %145 = shalt.err (!%p142_p12)
}
 0x10a   :  { %s146_s28 = scalar_lea.hbm %s209_s2, 16 }
 0x10b   :  { %p147_p13 = scmp.ne.s32.totalorder %s209_s2, %s146_s28  ;;  %p150_p0 = scmp.lt.u32.totalorder %s146_s28, %s209_s2 }
 0x10d   :  { %p152_p1 = pnand %p150_p0, %p147_p13 }
 0x10f   :  { %155 = shalt.err (!%p152_p1)
}
 0x110   :  { %97 = dma.vmem_to_hbm [thread:$0]  %s95_s1, 16, %s209_s2, [#allocation4]  }
 0x111   :  { %158 = dma.done.wait [#allocation4], 16  }
 0x112   :  { %159 = vsyncadd [#allocation4], 4294967280 }
 0x113   :  { %101 = vsyncpa [#allocation3], 1 }
 0x114   :  { %102 = vsyncpa [#allocation4], 1 }

</bundles_post_ra>
